<compile_context>
chip_gen: v7x
topology: tpu7x:2x2x1
jax: 0.10.0
libtpu: 0.0.40
codegen_flags: <defaults>
</compile_context>

<pallas_src>
import functools

import jax
import jax.numpy as jnp
from jax.experimental import pallas as pl
from jax.experimental.pallas import tpu as pltpu


def _round_up(x, m):
    return (x + m - 1) // m * m


def _gate_math(gates, c_cur, wci, wcf, wco, Cp):
    """Peephole LSTM gate math on (4*Cp, lanes) gate pre-activations."""
    i_pre = gates[0 * Cp:1 * Cp, :]
    f_pre = gates[1 * Cp:2 * Cp, :]
    g_pre = gates[2 * Cp:3 * Cp, :]
    o_pre = gates[3 * Cp:4 * Cp, :]
    # sigmoid / tanh go to the EUP slot; elementwise muls stay on the VPU.
    i_gate = jax.nn.sigmoid(wci * c_cur + i_pre)
    f_gate = jax.nn.sigmoid(wcf * c_cur + f_pre)
    c_new = f_gate * c_cur + i_gate * jnp.tanh(g_pre)
    o_gate = jax.nn.sigmoid(o_pre + wco * c_new)
    h_new = o_gate * jnp.tanh(c_new)
    return h_new, c_new


def _conv_lstm_kernel_single(patch_ref, c_ref, w_ref, b_ref, wci_ref, wcf_ref,
                             wco_ref, h_out_ref, c_out_ref, *, Cp):
    """Whole contraction in one MXU push (small K*K*Ctot).

    patch_ref : (1, KKCpad, TL)  bf16  im2col'd [x ; h_prev], channel-major
    c_ref     : (1, Cp, TL)      f32   previous cell state
    w_ref     : (4*Cp, KKCpad)   bf16  flattened conv weight
    b_ref     : (4*Cp, 1)        f32   conv bias
    wci/wcf/wco_ref : (Cp, TL)   f32   peephole weights
    """
    gates = jnp.dot(w_ref[...], patch_ref[0],
                    preferred_element_type=jnp.float32) + b_ref[...]
    c_cur = c_ref[0].astype(jnp.float32)
    h_new, c_new = _gate_math(gates, c_cur, wci_ref[...], wcf_ref[...],
                              wco_ref[...], Cp)
    h_out_ref[0] = h_new.astype(h_out_ref.dtype)
    c_out_ref[0] = c_new.astype(c_out_ref.dtype)


def _conv_lstm_kernel_ktiled(patch_ref, c_ref, w_ref, b_ref, wci_ref, wcf_ref,
                             wco_ref, h_out_ref, c_out_ref, acc_ref, *, Cp):
    """Contraction tiled over a third ("arbitrary") grid axis with a fp32
    VMEM accumulator.  Gate math / stores happen only on the last k step."""
    k = pl.program_id(2)

    @pl.when(k == 0)
    def _():
        acc_ref[...] = jnp.zeros_like(acc_ref)

    acc_ref[...] += jnp.dot(w_ref[...], patch_ref[0],
                            preferred_element_type=jnp.float32)

    @pl.when(k == pl.num_programs(2) - 1)
    def _():
        gates = acc_ref[...] + b_ref[...]
        c_cur = c_ref[0].astype(jnp.float32)
        h_new, c_new = _gate_math(gates, c_cur, wci_ref[...], wcf_ref[...],
                                  wco_ref[...], Cp)
        h_out_ref[0] = h_new.astype(h_out_ref.dtype)
        c_out_ref[0] = c_new.astype(c_out_ref.dtype)


def conv_lstm_cell_forward(x_nchw, h_nchw, c_nchw, conv_w_oihw, conv_b,
                           w_cell_in, w_cell_forget, w_cell_out,
                           *, batch_block=None, lane_tile=None, kkc_tile=None):
    """Pallas ConvLSTMCell forward.  PyTorch conventions:

    x_nchw:         [B, Cin, H, W]
    h_nchw, c_nchw: [B, Chid, H, W]
    conv_w_oihw:    [4*Chid, Cin+Chid, Kh, Kw]
    conv_b:         [4*Chid]
    w_cell_*:       [Chid, H, W]

    Returns (h_next, c_next), each [B, Chid, H, W].
    """
    B, Cin, H, W = x_nchw.shape
    Chid = h_nchw.shape[1]
    Co, Ci_w, Kh, Kw = conv_w_oihw.shape
    assert Co == 4 * Chid and Ci_w == Cin + Chid
    # SAME-padding reproduction (pad = K//2) only matches PyTorch for odd K.
    assert Kh % 2 == 1 and Kw % 2 == 1, "kernel size must be odd"
    ph, pw = Kh // 2, Kw // 2
    Ctot = Cin + Chid
    HW = H * W
    KKC = Kh * Kw * Ctot
    Cp = _round_up(Chid, 8)            # sublane-aligned gate slices
    out_dtype = x_nchw.dtype

    # Contraction tiling: single push for small KKC, grid-tiled otherwise.
    if kkc_tile is None:
        kkc_tile = _round_up(KKC, 8) if KKC <= 1024 else 1024
    KKCpad = _round_up(KKC, kkc_tile)
    nkt = KKCpad // kkc_tile
    if nkt > 1:
        assert kkc_tile % 128 == 0, "contraction tile must be lane-aligned"
    else:
        assert kkc_tile % 8 == 0

    # ---- layout glue (all XLA, outside the kernel): channel-major im2col ----
    combined = jnp.concatenate([x_nchw, h_nchw], axis=1)              # [B,Ctot,H,W]
    combined_p = jnp.pad(combined, ((0, 0), (0, 0), (ph, ph), (pw, pw)))
    taps = [combined_p[:, :, kh:kh + H, kw:kw + W]
            for kh in range(Kh) for kw in range(Kw)]                  # K*K windows
    patch = jnp.stack(taps, axis=1).reshape(B, KKC, HW)               # [B,KKC,HW]
    if KKCpad > KKC:
        patch = jnp.pad(patch, ((0, 0), (0, KKCpad - KKC), (0, 0)))
    patch = patch.astype(jnp.bfloat16)

    c2 = c_nchw.reshape(B, Chid, HW).astype(jnp.float32)
    if Cp > Chid:
        c2 = jnp.pad(c2, ((0, 0), (0, Cp - Chid), (0, 0)))

    # Fold `bb` batch elements into the lane axis -> one big lane-dense matmul
    # per grid step instead of bb tiny ones, and amortized per-step overhead.
    bb = batch_block if batch_block is not None else min(B, 8)
    nb = -(-B // bb)
    Bp = nb * bb
    if Bp > B:
        patch = jnp.pad(patch, ((0, Bp - B), (0, 0), (0, 0)))
        c2 = jnp.pad(c2, ((0, Bp - B), (0, 0), (0, 0)))
    LW = bb * HW
    patch = patch.reshape(nb, bb, KKCpad, HW).transpose(0, 2, 1, 3).reshape(
        nb, KKCpad, LW)
    c2 = c2.reshape(nb, bb, Cp, HW).transpose(0, 2, 1, 3).reshape(nb, Cp, LW)

    # Conv weight: [4C, Ctot, Kh, Kw] -> [4*Cp, KKCpad] (tap-major contraction
    # dim matching `patch`, gate-major rows, per-gate rows padded to Cp).
    w_flat = jnp.transpose(conv_w_oihw, (0, 2, 3, 1)).reshape(4, Chid, KKC)
    if Cp > Chid:
        w_flat = jnp.pad(w_flat, ((0, 0), (0, Cp - Chid), (0, 0)))
    w_flat = w_flat.reshape(4 * Cp, KKC)
    if KKCpad > KKC:
        w_flat = jnp.pad(w_flat, ((0, 0), (0, KKCpad - KKC)))
    w_flat = w_flat.astype(jnp.bfloat16)

    bias2 = conv_b.reshape(4, Chid).astype(jnp.float32)
    if Cp > Chid:
        bias2 = jnp.pad(bias2, ((0, 0), (0, Cp - Chid)))
    bias2 = bias2.reshape(4 * Cp, 1)

    # Peepholes: [Chid,H,W] -> [Cp,HW], replicated across the folded batch
    # block so lane indexing matches the (bb, HW) lane axis.
    def _peep(wc):
        wc = wc.reshape(Chid, HW).astype(jnp.float32)
        if Cp > Chid:
            wc = jnp.pad(wc, ((0, Cp - Chid), (0, 0)))
        return jnp.tile(wc, (1, bb))
    wci = _peep(w_cell_in)
    wcf = _peep(w_cell_forget)
    wco = _peep(w_cell_out)

    # Lane tiling: bounds the live (4*Cp, TL) gate block and provides a second
    # parallel grid axis (keeps both v7x TensorCores busy even at B=1).
    if lane_tile is None:
        lane_tile = LW
        if LW % 128 == 0 and LW > 2048:
            for cand in range(2048, 0, -128):
                if LW % cand == 0:
                    lane_tile = cand
                    break
    assert LW % lane_tile == 0
    nlt = LW // lane_tile

    out_shape = (
        jax.ShapeDtypeStruct((nb, Cp, LW), out_dtype),
        jax.ShapeDtypeStruct((nb, Cp, LW), out_dtype),
    )

    if nkt == 1:
        kernel = functools.partial(_conv_lstm_kernel_single, Cp=Cp)
        grid = (nb, nlt)
        in_specs = [
            pl.BlockSpec((1, KKCpad, lane_tile), lambda i, j: (i, 0, j)),  # patch
            pl.BlockSpec((1, Cp, lane_tile), lambda i, j: (i, 0, j)),      # c_prev
            pl.BlockSpec((4 * Cp, KKCpad), lambda i, j: (0, 0)),           # weight
            pl.BlockSpec((4 * Cp, 1), lambda i, j: (0, 0)),                # bias
            pl.BlockSpec((Cp, lane_tile), lambda i, j: (0, j)),            # wci
            pl.BlockSpec((Cp, lane_tile), lambda i, j: (0, j)),            # wcf
            pl.BlockSpec((Cp, lane_tile), lambda i, j: (0, j)),            # wco
        ]
        out_specs = [
            pl.BlockSpec((1, Cp, lane_tile), lambda i, j: (i, 0, j)),
            pl.BlockSpec((1, Cp, lane_tile), lambda i, j: (i, 0, j)),
        ]
        scratch_shapes = ()
        dim_sem = ("parallel", "parallel")
    else:
        kernel = functools.partial(_conv_lstm_kernel_ktiled, Cp=Cp)
        grid = (nb, nlt, nkt)
        in_specs = [
            pl.BlockSpec((1, kkc_tile, lane_tile), lambda i, j, k: (i, k, j)),
            pl.BlockSpec((1, Cp, lane_tile), lambda i, j, k: (i, 0, j)),
            pl.BlockSpec((4 * Cp, kkc_tile), lambda i, j, k: (0, k)),
            pl.BlockSpec((4 * Cp, 1), lambda i, j, k: (0, 0)),
            pl.BlockSpec((Cp, lane_tile), lambda i, j, k: (0, j)),
            pl.BlockSpec((Cp, lane_tile), lambda i, j, k: (0, j)),
            pl.BlockSpec((Cp, lane_tile), lambda i, j, k: (0, j)),
        ]
        out_specs = [
            pl.BlockSpec((1, Cp, lane_tile), lambda i, j, k: (i, 0, j)),
            pl.BlockSpec((1, Cp, lane_tile), lambda i, j, k: (i, 0, j)),
        ]
        scratch_shapes = (pltpu.VMEM((4 * Cp, lane_tile), jnp.float32),)
        dim_sem = ("parallel", "parallel", "arbitrary")

    grid_spec = pltpu.PrefetchScalarGridSpec(
        num_scalar_prefetch=0,
        grid=grid,
        in_specs=in_specs,
        out_specs=out_specs,
        scratch_shapes=scratch_shapes,
    )

    h_all, c_all = pl.pallas_call(
        kernel,
        out_shape=out_shape,
        grid_spec=grid_spec,
        compiler_params=pltpu.CompilerParams(dimension_semantics=dim_sem),
    )(patch, c2, w_flat, bias2, wci, wcf, wco)

    def _unfold(y):
        y = y.reshape(nb, Cp, bb, HW).transpose(0, 2, 1, 3)
        return y.reshape(Bp, Cp, H, W)[:B, :Chid]

    return _unfold(h_all), _unfold(c_all)


def _reference_forward(x, h, c, w, b, wci, wcf, wco):
    """Pure-JAX reference matching the PyTorch forward (NCHW, fp32 conv)."""
    combined = jnp.concatenate([x, h], axis=1)
    conv = jax.lax.conv_general_dilated(
        combined, w, window_strides=(1, 1), padding="SAME",
        dimension_numbers=("NCHW", "OIHW", "NCHW"))
    conv = conv + b[None, :, None, None]
    i_pre, f_pre, g_pre, o_pre = jnp.split(conv, 4, axis=1)
    i_g = jax.nn.sigmoid(wci[None] * c + i_pre)
    f_g = jax.nn.sigmoid(wcf[None] * c + f_pre)
    c_new = f_g * c + i_g * jnp.tanh(g_pre)
    o_g = jax.nn.sigmoid(o_pre + wco[None] * c_new)
    h_new = o_g * jnp.tanh(c_new)
    return h_new, c_new


def _run_case(key, B, Cin, Chid, H, W, K, **kw):
    ks = jax.random.split(key, 8)
    x = jax.random.normal(ks[0], (B, Cin, H, W), jnp.float32)
    h0 = jax.random.normal(ks[1], (B, Chid, H, W), jnp.float32)
    c0 = jax.random.normal(ks[2], (B, Chid, H, W), jnp.float32)
    # Synthetic parameters (peephole weights are zero-init in PyTorch;
    # randomized here so the full compute path is exercised).
    conv_w = jax.random.normal(ks[3], (4 * Chid, Cin + Chid, K, K), jnp.float32) * 0.1
    conv_b = jax.random.normal(ks[4], (4 * Chid,), jnp.float32) * 0.1
    wci = jax.random.normal(ks[5], (Chid, H, W), jnp.float32) * 0.1
    wcf = jax.random.normal(ks[6], (Chid, H, W), jnp.float32) * 0.1
    wco = jax.random.normal(ks[7], (Chid, H, W), jnp.float32) * 0.1

    h_next, c_next = conv_lstm_cell_forward(x, h0, c0, conv_w, conv_b,
                                            wci, wcf, wco, **kw)
    jax.block_until_ready((h_next, c_next))

    h_ref, c_ref = _reference_forward(x, h0, c0, conv_w, conv_b, wci, wcf, wco)
    assert h_next.shape == (B, Chid, H, W) and c_next.shape == (B, Chid, H, W)
    # Tolerance accounts for bf16 MXU operands (fp32 accumulation) in the
    # kernel vs. the fp32 reference convolution.
    assert jnp.allclose(h_next, h_ref, atol=5e-2, rtol=5e-2)
    assert jnp.allclose(c_next, c_ref, atol=5e-2, rtol=5e-2)


if __name__ == "__main__":
    key = jax.random.PRNGKey(0)
    k1, k2 = jax.random.split(key)

    # Primary small config (single-push contraction path).
    _run_case(k1, B=2, Cin=4, Chid=8, H=16, W=16, K=3)

    # Secondary config exercising the contraction-tiled accumulator path and
    # the hidden-dim sublane padding (Chid=28 -> Cp=32, KKC=288 -> 3 k-tiles).
    _run_case(k2, B=2, Cin=4, Chid=28, H=16, W=16, K=3, kkc_tile=128)

    print("KERNEL_OK")
</pallas_src>

<mosaic_0001>
module attributes {stable_mosaic.version = 11 : i64} {
  func.func @_conv_lstm_kernel_single(%arg0: i32, %arg1: i32, %arg2: memref<1x112x512xbf16, #tpu.memory_space<vmem>>, %arg3: memref<1x8x512xf32, #tpu.memory_space<vmem>>, %arg4: memref<32x112xbf16, #tpu.memory_space<vmem>>, %arg5: memref<32x1xf32, #tpu.memory_space<vmem>>, %arg6: memref<8x512xf32, #tpu.memory_space<vmem>>, %arg7: memref<8x512xf32, #tpu.memory_space<vmem>>, %arg8: memref<8x512xf32, #tpu.memory_space<vmem>>, %arg9: memref<1x8x512xf32, #tpu.memory_space<vmem>>, %arg10: memref<1x8x512xf32, #tpu.memory_space<vmem>>) attributes {dimension_semantics = [#tpu.dimension_semantics<parallel>, #tpu.dimension_semantics<parallel>], iteration_bounds = array<i64: 1, 1>, scalar_prefetch = 0 : i64, scratch_operands = 0 : i64, tpu.core_type = #tpu.core_type<tc>, window_params = [{transform_indices = @transform_0, window_bounds = array<i64: 1, 112, 512>}, {transform_indices = @transform_1, window_bounds = array<i64: 1, 8, 512>}, {pipeline_mode = #tpu.pipeline_mode<synchronous>, transform_indices = @transform_2, window_bounds = array<i64: 32, 112>}, {pipeline_mode = #tpu.pipeline_mode<synchronous>, transform_indices = @transform_3, window_bounds = array<i64: 32, 1>}, {transform_indices = @transform_4, window_bounds = array<i64: 8, 512>}, {transform_indices = @transform_5, window_bounds = array<i64: 8, 512>}, {transform_indices = @transform_6, window_bounds = array<i64: 8, 512>}, {transform_indices = @transform_7, window_bounds = array<i64: 1, 8, 512>}, {transform_indices = @transform_8, window_bounds = array<i64: 1, 8, 512>}]} {
    %c0 = arith.constant 0 : index
    %c0_0 = arith.constant 0 : index
    %0 = vector.load %arg4[%c0, %c0_0] : memref<32x112xbf16, #tpu.memory_space<vmem>>, vector<32x112xbf16>
    %c0_1 = arith.constant 0 : index
    %c0_2 = arith.constant 0 : index
    %c0_3 = arith.constant 0 : index
    %1 = vector.load %arg2[%c0_1, %c0_2, %c0_3] : memref<1x112x512xbf16, #tpu.memory_space<vmem>>, vector<1x112x512xbf16>
    %2 = vector.shape_cast %1 : vector<1x112x512xbf16> to vector<112x512xbf16>
    %cst = arith.constant dense<0.000000e+00> : vector<32x512xf32>
    %3 = tpu.matmul %0, %2, %cst {dimension_numbers = #tpu.dot_dimension_numbers<[1], [0], [0], [1], [0, 0, 1, 1], [], []>} : vector<32x112xbf16>, vector<112x512xbf16>, vector<32x512xf32> -> vector<32x512xf32>
    %c0_4 = arith.constant 0 : index
    %c0_5 = arith.constant 0 : index
    %4 = vector.load %arg5[%c0_4, %c0_5] : memref<32x1xf32, #tpu.memory_space<vmem>>, vector<32x1xf32>
    %5 = vector.broadcast %4 : vector<32x1xf32> to vector<32x512xf32>
    %6 = arith.addf %3, %5 : vector<32x512xf32>
    %c0_6 = arith.constant 0 : index
    %c0_7 = arith.constant 0 : index
    %c0_8 = arith.constant 0 : index
    %7 = vector.load %arg3[%c0_6, %c0_7, %c0_8] : memref<1x8x512xf32, #tpu.memory_space<vmem>>, vector<1x8x512xf32>
    %8 = vector.shape_cast %7 : vector<1x8x512xf32> to vector<8x512xf32>
    %c0_9 = arith.constant 0 : index
    %c0_10 = arith.constant 0 : index
    %9 = vector.load %arg6[%c0_9, %c0_10] : memref<8x512xf32, #tpu.memory_space<vmem>>, vector<8x512xf32>
    %c0_11 = arith.constant 0 : index
    %c0_12 = arith.constant 0 : index
    %10 = vector.load %arg7[%c0_11, %c0_12] : memref<8x512xf32, #tpu.memory_space<vmem>>, vector<8x512xf32>
    %c0_13 = arith.constant 0 : index
    %c0_14 = arith.constant 0 : index
    %11 = vector.load %arg8[%c0_13, %c0_14] : memref<8x512xf32, #tpu.memory_space<vmem>>, vector<8x512xf32>
    %12 = vector.extract_strided_slice %6 {offsets = [0, 0], sizes = [8, 512], strides = [1, 1]} : vector<32x512xf32> to vector<8x512xf32>
    %13 = vector.extract_strided_slice %6 {offsets = [8, 0], sizes = [8, 512], strides = [1, 1]} : vector<32x512xf32> to vector<8x512xf32>
    %14 = vector.extract_strided_slice %6 {offsets = [16, 0], sizes = [8, 512], strides = [1, 1]} : vector<32x512xf32> to vector<8x512xf32>
    %15 = vector.extract_strided_slice %6 {offsets = [24, 0], sizes = [8, 512], strides = [1, 1]} : vector<32x512xf32> to vector<8x512xf32>
    %16 = arith.mulf %9, %8 : vector<8x512xf32>
    %17 = arith.addf %16, %12 : vector<8x512xf32>
    %18 = arith.negf %17 : vector<8x512xf32>
    %19 = math.exp %18 : vector<8x512xf32>
    %cst_15 = arith.constant 1.000000e+00 : f32
    %20 = vector.broadcast %cst_15 : f32 to vector<8x512xf32>
    %21 = arith.addf %20, %19 : vector<8x512xf32>
    %22 = arith.divf %20, %21 : vector<8x512xf32>
    %23 = arith.mulf %10, %8 : vector<8x512xf32>
    %24 = arith.addf %23, %13 : vector<8x512xf32>
    %25 = arith.negf %24 : vector<8x512xf32>
    %26 = math.exp %25 : vector<8x512xf32>
    %cst_16 = arith.constant 1.000000e+00 : f32
    %27 = vector.broadcast %cst_16 : f32 to vector<8x512xf32>
    %28 = arith.addf %27, %26 : vector<8x512xf32>
    %29 = arith.divf %27, %28 : vector<8x512xf32>
    %30 = arith.mulf %29, %8 : vector<8x512xf32>
    %31 = math.tanh %14 : vector<8x512xf32>
    %32 = arith.mulf %22, %31 : vector<8x512xf32>
    %33 = arith.addf %30, %32 : vector<8x512xf32>
    %34 = arith.mulf %11, %33 : vector<8x512xf32>
    %35 = arith.addf %15, %34 : vector<8x512xf32>
    %36 = arith.negf %35 : vector<8x512xf32>
    %37 = math.exp %36 : vector<8x512xf32>
    %cst_17 = arith.constant 1.000000e+00 : f32
    %38 = vector.broadcast %cst_17 : f32 to vector<8x512xf32>
    %39 = arith.addf %38, %37 : vector<8x512xf32>
    %40 = arith.divf %38, %39 : vector<8x512xf32>
    %41 = math.tanh %33 : vector<8x512xf32>
    %42 = arith.mulf %40, %41 : vector<8x512xf32>
    %c0_18 = arith.constant 0 : index
    %c0_19 = arith.constant 0 : index
    %c0_20 = arith.constant 0 : index
    %43 = vector.load %arg9[%c0_18, %c0_19, %c0_20] : memref<1x8x512xf32, #tpu.memory_space<vmem>>, vector<1x8x512xf32>
    %44 = vector.shape_cast %43 : vector<1x8x512xf32> to vector<8x512xf32>
    %45 = vector.shape_cast %42 : vector<8x512xf32> to vector<1x8x512xf32>
    tpu.vector_store %arg9[%c0_18, %c0_19, %c0_20], %45 {strides = array<i32>} : memref<1x8x512xf32, #tpu.memory_space<vmem>>, vector<1x8x512xf32>,
    %c0_21 = arith.constant 0 : index
    %c0_22 = arith.constant 0 : index
    %c0_23 = arith.constant 0 : index
    %46 = vector.load %arg10[%c0_21, %c0_22, %c0_23] : memref<1x8x512xf32, #tpu.memory_space<vmem>>, vector<1x8x512xf32>
    %47 = vector.shape_cast %46 : vector<1x8x512xf32> to vector<8x512xf32>
    %48 = vector.shape_cast %33 : vector<8x512xf32> to vector<1x8x512xf32>
    tpu.vector_store %arg10[%c0_21, %c0_22, %c0_23], %48 {strides = array<i32>} : memref<1x8x512xf32, #tpu.memory_space<vmem>>, vector<1x8x512xf32>,
    return
  }
  func.func @transform_0(%arg0: i32, %arg1: i32) -> (i32, i32, i32) {
    %c0_i32 = arith.constant 0 : i32
    %c0_i32_0 = arith.constant 0 : i32
    return %arg0, %c0_i32, %arg1 : i32, i32, i32
  }
  func.func @transform_1(%arg0: i32, %arg1: i32) -> (i32, i32, i32) {
    %c0_i32 = arith.constant 0 : i32
    %c0_i32_0 = arith.constant 0 : i32
    return %arg0, %c0_i32, %arg1 : i32, i32, i32
  }
  func.func @transform_2(%arg0: i32, %arg1: i32) -> (i32, i32) {
    %c0_i32 = arith.constant 0 : i32
    %c0_i32_0 = arith.constant 0 : i32
    %c0_i32_1 = arith.constant 0 : i32
    return %c0_i32, %c0_i32_0 : i32, i32
  }
  func.func @transform_3(%arg0: i32, %arg1: i32) -> (i32, i32) {
    %c0_i32 = arith.constant 0 : i32
    %c0_i32_0 = arith.constant 0 : i32
    %c0_i32_1 = arith.constant 0 : i32
    return %c0_i32, %c0_i32_0 : i32, i32
  }
  func.func @transform_4(%arg0: i32, %arg1: i32) -> (i32, i32) {
    %c0_i32 = arith.constant 0 : i32
    %c0_i32_0 = arith.constant 0 : i32
    return %c0_i32, %arg1 : i32, i32
  }
  func.func @transform_5(%arg0: i32, %arg1: i32) -> (i32, i32) {
    %c0_i32 = arith.constant 0 : i32
    %c0_i32_0 = arith.constant 0 : i32
    return %c0_i32, %arg1 : i32, i32
  }
  func.func @transform_6(%arg0: i32, %arg1: i32) -> (i32, i32) {
    %c0_i32 = arith.constant 0 : i32
    %c0_i32_0 = arith.constant 0 : i32
    return %c0_i32, %arg1 : i32, i32
  }
  func.func @transform_7(%arg0: i32, %arg1: i32) -> (i32, i32, i32) {
    %c0_i32 = arith.constant 0 : i32
    %c0_i32_0 = arith.constant 0 : i32
    return %arg0, %c0_i32, %arg1 : i32, i32, i32
  }
  func.func @transform_8(%arg0: i32, %arg1: i32) -> (i32, i32, i32) {
    %c0_i32 = arith.constant 0 : i32
    %c0_i32_0 = arith.constant 0 : i32
    return %arg0, %c0_i32, %arg1 : i32, i32, i32
  }
}

</mosaic_0001>

<bundles_post_ra>
// kernel: tpu_custom_call.1
= control target key start
LH: loop header
LB: loop body
LE: loop exit
PB: predicated region body
PF: predicated region fallthrough
CT: control target
= control target key end

     0   :  { %14 = vsyncpa [#allocation3], 0  ;;  %s1122_s0 = inlined_call_operand.hbm [shape: bf16[1,112,512], index: 0, kind: input, shape index: {}]   ;;  %s1123_s1 = inlined_call_operand.vmem [shape: f32[1,8,512], index: 1, kind: input, shape index: {}]   ;;  %s1124_s2 = inlined_call_operand.hbm [shape: bf16[32,112], index: 2, kind: input, shape index: {}]   ;;  %s1125_s3 = inlined_call_operand.vmem [shape: f32[32,1], index: 3, kind: input, shape index: {}]   ;;  %s1126_s4 = inlined_call_operand.hbm [shape: f32[8,512], index: 4, kind: input, shape index: {}]   ;;  %s1127_s5 = inlined_call_operand.hbm [shape: f32[8,512], index: 5, kind: input, shape index: {}]   ;;  %s1128_s6 = inlined_call_operand.hbm [shape: f32[8,512], index: 6, kind: input, shape index: {}]   ;;  %s1129_s7 = inlined_call_operand.hbm [shape: f32[1,8,512], index: 7, kind: output, shape index: {0}]   ;;  %s1130_s8 = inlined_call_operand.hbm [shape: f32[1,8,512], index: 8, kind: output, shape index: {1}]  }
   0x1   :  { %15 = vsyncpa [#allocation6], 0 }
   0x2   :  { %16 = vsyncpa [#allocation9], 0 }
   0x3   :  { %17 = vsyncpa [#allocation4], 0 }
   0x4   :  { %18 = vsyncpa [#allocation13], 0  ;;  %s919_s27 = smov [#allocation5]   ;;  %s755_s9 = scalar_lea.hbm %s1124_s2, 256 }
   0x5   :  { %s38_s28 = sshll.u32 %s919_s27, 4  ;;  %p756_p0 = scmp.ne.s32.totalorder %s1124_s2, %s755_s9  ;;  %s39_s28 = int_to_ptr.vmem [resolvable:$true] %s38_s28 }
   0x6   :  { %p759_p1 = scmp.lt.u32.totalorder %s755_s9, %s1124_s2 }
   0x8   :  { %p761_p2 = pnand %p759_p1, %p756_p0 }
   0xa   :  { %764 = shalt.err (!%p761_p2)
}
   0xb   :  { %s765_s14 = scalar_lea.vmem %s39_s28, 256  ;;  %p770_p4 = scmp.lt.s32.totalorder %s39_s28, %s39_s28 }
   0xc   :  { %p766_p3 = scmp.ne.s32.totalorder %s39_s28, %s765_s14  ;;  %p771_p5 = scmp.lt.s32.totalorder %s765_s14, %s765_s14 }
   0xe   :  { %p772_p6 = por %p771_p5, %p770_p4 }
  0x10   :  { %p773_p7 = pnand %p772_p6, %p766_p3 }
  0x12   :  { %776 = shalt.err (!%p773_p7)
}
  0x13   :  { %s920_s15 = smov 64   ;;  %s921_s16 = smov 4  }
  0x14   :  { %44 = dma.hbm_to_vmem [thread:$0]  %s1124_s2, 256, %s39_s28, [#allocation6], %s920_s15, %s920_s15, %s921_s16  }
  0x15   :  { %s922_s19 = smov [#allocation8]   ;;  %s923_s21 = smov [#allocation2]  }
  0x16   :  { %s63_s20 = sshll.u32 %s922_s19, 4  ;;  %s24_s22 = sshll.u32 %s923_s21, 4  ;;  %s64_s20 = int_to_ptr.vmem [resolvable:$true] %s63_s20  ;;  %s25_s22 = int_to_ptr.vmem [resolvable:$true] %s24_s22 }
  0x17   :  { %s777_s25 = scalar_lea.hbm %s1127_s5, 512 }
  0x18   :  { %p778_p8 = scmp.ne.s32.totalorder %s1127_s5, %s777_s25  ;;  %p781_p9 = scmp.lt.u32.totalorder %s777_s25, %s1127_s5 }
  0x1a   :  { %p783_p10 = pnand %p781_p9, %p778_p8 }
  0x1c   :  { %786 = shalt.err (!%p783_p10)
}
  0x1d   :  { %s787_s2 = scalar_lea.vmem %s64_s20, 512  ;;  %p792_p12 = scmp.lt.s32.totalorder %s64_s20, %s64_s20 }
  0x1e   :  { %p788_p11 = scmp.ne.s32.totalorder %s64_s20, %s787_s2  ;;  %p793_p13 = scmp.lt.s32.totalorder %s787_s2, %s787_s2 }
  0x20   :  { %p794_p0 = por %p793_p13, %p792_p12 }
  0x22   :  { %p795_p1 = pnand %p794_p0, %p788_p11 }
  0x24   :  { %798 = shalt.err (!%p795_p1)
}
  0x25   :  { %66 = dma.hbm_to_vmem [thread:$0]  %s1127_s5, 512, %s64_s20, [#allocation9]  }
  0x26   :  { %s799_s12 = scalar_lea.hbm %s1122_s0, 3584 }
  0x27   :  { %p800_p2 = scmp.ne.s32.totalorder %s1122_s0, %s799_s12  ;;  %p803_p3 = scmp.lt.u32.totalorder %s799_s12, %s1122_s0 }
  0x29   :  { %p805_p4 = pnand %p803_p3, %p800_p2 }
  0x2b   :  { %808 = shalt.err (!%p805_p4)
}
  0x2c   :  { %s809_s17 = scalar_lea.vmem %s25_s22, 3584  ;;  %p814_p6 = scmp.lt.s32.totalorder %s25_s22, %s25_s22 }
  0x2d   :  { %p810_p5 = scmp.ne.s32.totalorder %s25_s22, %s809_s17  ;;  %p815_p7 = scmp.lt.s32.totalorder %s809_s17, %s809_s17 }
  0x2f   :  { %p816_p8 = por %p815_p7, %p814_p6 }
  0x31   :  { %p817_p9 = pnand %p816_p8, %p810_p5 }
  0x33   :  { %820 = shalt.err (!%p817_p9)
}
  0x34   :  { %s924_s5 = smov 256   ;;  %s925_s18 = smov 16  }
  0x35   :  { %30 = dma.hbm_to_vmem [thread:$0]  %s1122_s0, 3584, %s25_s22, [#allocation3], %s924_s5, %s924_s5, %s925_s18  }
  0x36   :  { %s926_s21 = smov [#allocation7]   ;;  %s927_s24 = smov [#allocation10]  }
  0x37   :  { %s53_s23 = sshll.u32 %s926_s21, 4  ;;  %s73_s25 = sshll.u32 %s927_s24, 4  ;;  %s54_s23 = int_to_ptr.vmem [resolvable:$true] %s53_s23  ;;  %s74_s25 = int_to_ptr.vmem [resolvable:$true] %s73_s25 }
  0x38   :  { %s821_s29 = scalar_lea.hbm %s1126_s4, 512 }
  0x39   :  { %p822_p10 = scmp.ne.s32.totalorder %s1126_s4, %s821_s29  ;;  %p825_p11 = scmp.lt.u32.totalorder %s821_s29, %s1126_s4 }
  0x3b   :  { %p827_p12 = pnand %p825_p11, %p822_p10 }
  0x3d   :  { %830 = shalt.err (!%p827_p12)
}
  0x3e   :  { %s831_s0 = scalar_lea.vmem %s54_s23, 512  ;;  %p836_p0 = scmp.lt.s32.totalorder %s54_s23, %s54_s23 }
  0x3f   :  { %p832_p13 = scmp.ne.s32.totalorder %s54_s23, %s831_s0  ;;  %p837_p1 = scmp.lt.s32.totalorder %s831_s0, %s831_s0 }
  0x41   :  { %p838_p2 = por %p837_p1, %p836_p0 }
  0x43   :  { %p839_p3 = pnand %p838_p2, %p832_p13 }
  0x45   :  { %842 = shalt.err (!%p839_p3)
}
  0x46   :  { %56 = dma.hbm_to_vmem [thread:$0]  %s1126_s4, 512, %s54_s23, [#allocation6]  }
  0x47   :  { %s843_s13 = scalar_lea.hbm %s1128_s6, 512 }
  0x48   :  { %p844_p4 = scmp.ne.s32.totalorder %s1128_s6, %s843_s13  ;;  %p847_p5 = scmp.lt.u32.totalorder %s843_s13, %s1128_s6 }
  0x4a   :  { %p849_p6 = pnand %p847_p5, %p844_p4 }
  0x4c   :  { %852 = shalt.err (!%p849_p6)
}
  0x4d   :  { %s853_s5 = scalar_lea.vmem %s74_s25, 512  ;;  %p858_p8 = scmp.lt.s32.totalorder %s74_s25, %s74_s25 }
  0x4e   :  { %p854_p7 = scmp.ne.s32.totalorder %s74_s25, %s853_s5  ;;  %p859_p9 = scmp.lt.s32.totalorder %s853_s5, %s853_s5 }
  0x50   :  { %p860_p10 = por %p859_p9, %p858_p8 }
  0x52   :  { %p861_p11 = pnand %p860_p10, %p854_p7 }
  0x54   :  { %864 = shalt.err (!%p861_p11)
}
  0x55   :  { %76 = dma.hbm_to_vmem [thread:$0]  %s1128_s6, 512, %s74_s25, [#allocation9]  }
  0x56   :  { %909 = dma.done.wait [#allocation3], 3584  }
  0x57   :  { %910 = vsyncadd [#allocation3], 4294963712 }
  0x58   :  { %911 = dma.done.wait [#allocation6], 768  }
  0x59   :  { %912 = vsyncadd [#allocation6], 4294966528 }
  0x5a   :  { %913 = dma.done.wait [#allocation9], 1024  }
  0x5b   :  { %914 = vsyncadd [#allocation9], 4294966272  ;;  %v928_v0 = vmov 0   ;;  %v647_v1 = vld [vmem:[#allocation2 + $0x4] ss:$16 sps:$4 sm:$0xff]   ;;  %v126_v29 = vld [vmem:[%s1125_s3 + $0x8] sm:$0xff] }
  0x5c   :  { %338 = vmatprep.mubr.bf16.mxu0 %v928_v0  ;;  %391 = vmatprep.mubr.bf16.mxu1 %v928_v0  ;;  %v649_v2 = vld [vmem:[#allocation2 + $0xc] ss:$16 sps:$4 sm:$0xff]   ;;  %v651_v3 = vld [vmem:[#allocation2] ss:$16 sps:$4 sm:$0xff]   ;;  %v652_v4 = vld [vmem:[#allocation2 + $0x8] ss:$16 sps:$4 sm:$0xff]  }
  0x5d   :  { %645 = vset.pattern.permute.xlu0 %v928_v0  ;;  %646 = vset.pattern.permute.xlu1 %v928_v0  ;;  %v653_v5 = vld [vmem:[#allocation2 + $0x24] ss:$16 sps:$4 sm:$0xff]   ;;  %v655_v6 = vld [vmem:[#allocation2 + $0x2c] ss:$16 sps:$4 sm:$0xff]   ;;  %v657_v7 = vld [vmem:[#allocation2 + $0x20] ss:$16 sps:$4 sm:$0xff]  }
  0x5e   :  { %306 = vmatprep.subr.bf16.mxu0 %v647_v1  ;;  %359 = vmatprep.subr.bf16.mxu1 %v649_v2  ;;  %v658_v8 = vld [vmem:[#allocation2 + $0x28] ss:$16 sps:$4 sm:$0xff]   ;;  %v659_v9 = vld [vmem:[#allocation2 + $0x44] ss:$16 sps:$4 sm:$0xff]   ;;  %v661_v10 = vld [vmem:[#allocation2 + $0x4c] ss:$16 sps:$4 sm:$0xff]  }
  0x5f   :  { %307 = vmatpush1.bf16.msra.mxu0 %v651_v3  ;;  %360 = vmatpush1.bf16.msra.mxu1 %v652_v4  ;;  %v663_v11 = vld [vmem:[#allocation2 + $0x40] ss:$16 sps:$4 sm:$0xff]   ;;  %v664_v12 = vld [vmem:[#allocation2 + $0x48] ss:$16 sps:$4 sm:$0xff]   ;;  %v665_v13 = vld [vmem:[#allocation2 + $0x64] ss:$16 sps:$4 sm:$0xff]  }
  0x60   :  { %308 = vmatprep.subr.bf16.mxu0 %v653_v5  ;;  %361 = vmatprep.subr.bf16.mxu1 %v655_v6  ;;  %v667_v14 = vld [vmem:[#allocation2 + $0x6c] ss:$16 sps:$4 sm:$0xff]   ;;  %v669_v15 = vld [vmem:[#allocation2 + $0x60] ss:$16 sps:$4 sm:$0xff]   ;;  %v670_v16 = vld [vmem:[#allocation2 + $0x68] ss:$16 sps:$4 sm:$0xff]  }
  0x61   :  { %v671_v17 = vld [vmem:[#allocation2 + $0x84] ss:$16 sps:$4 sm:$0xff]   ;;  %v673_v18 = vld [vmem:[#allocation2 + $0x8c] ss:$16 sps:$4 sm:$0xff]   ;;  %v675_v19 = vld [vmem:[#allocation2 + $0x80] ss:$16 sps:$4 sm:$0xff]  }
  0x62   :  { %v676_v20 = vld [vmem:[#allocation2 + $0x88] ss:$16 sps:$4 sm:$0xff]   ;;  %v677_v21 = vld [vmem:[#allocation2 + $0xa4] ss:$16 sps:$4 sm:$0xff]   ;;  %v679_v22 = vld [vmem:[#allocation2 + $0xac] ss:$16 sps:$4 sm:$0xff]  }
  0x63   :  { %309 = vmatpush1.bf16.msra.mxu0 %v657_v7  ;;  %362 = vmatpush1.bf16.msra.mxu1 %v658_v8  ;;  %v681_v23 = vld [vmem:[#allocation2 + $0xa0] ss:$16 sps:$4 sm:$0xff]   ;;  %v682_v24 = vld [vmem:[#allocation2 + $0xa8] ss:$16 sps:$4 sm:$0xff]   ;;  %v683_v26 = vld [vmem:[#allocation2 + $0xc4] ss:$16 sps:$4 sm:$0xff]  }
  0x64   :  { %310 = vmatprep.subr.bf16.mxu0 %v659_v9  ;;  %363 = vmatprep.subr.bf16.mxu1 %v661_v10  ;;  %v125_v25 = vld [vmem:[%s1125_s3] sm:$0xff]  ;;  %v685_v27 = vld [vmem:[#allocation2 + $0xcc] ss:$16 sps:$4 sm:$0xff]   ;;  %v127_v28 = vld [vmem:[%s1125_s3 + $0x10] sm:$0xff]  ;;  %vm299_vm0 = vcmask 916480  }
  0x65   :  { %131 = vperm.xlu0 %645, %v125_v25   ;;  %141 = vperm.xlu1 %646, %v127_v28   ;;  %v128_v30 = vld [vmem:[%s1125_s3 + $0x18] sm:$0xff]  ;;  %v687_v31 = vld [vmem:[#allocation2 + $0xc0] ss:$16 sps:$4 sm:$0xff]   ;;  %v690_v34 = vld [vmem:[#allocation5 + $0x8] sm:$0xff]  }
  0x66   :  { %v688_v32 = vld [vmem:[#allocation2 + $0xc8] ss:$16 sps:$4 sm:$0xff]   ;;  %v689_v33 = vld [vmem:[#allocation5] sm:$0xff]   ;;  %v416_v37 = vld [vmem:[#allocation7] sm:$0xff] }
  0x67   :  { %311 = vmatpush1.bf16.msra.mxu0 %v663_v11  ;;  %364 = vmatpush1.bf16.msra.mxu1 %v664_v12  ;;  %v1057_v36 = vld [vmem:[%s1123_s1] sm:$0xff]  ;;  %v1062_v38 = vld [vmem:[%s1123_s1 + $0x10] sm:$0xff]  ;;  %v1067_v40 = vld [vmem:[%s1123_s1 + $0x8] sm:$0xff] }
  0x68   :  { %312 = vmatprep.subr.bf16.mxu0 %v665_v13  ;;  %365 = vmatprep.subr.bf16.mxu1 %v667_v14  ;;  %v418_v39 = vld [vmem:[#allocation7 + $0x10] sm:$0xff]  ;;  %v417_v41 = vld [vmem:[#allocation7 + $0x8] sm:$0xff]  ;;  %v419_v43 = vld [vmem:[#allocation7 + $0x18] sm:$0xff]  ;;  %v428_v47 = vmul.f32 %v416_v37, %v1057_v36 }
  0x69   :  { %136 = vperm.xlu0 %645, %v126_v29   ;;  %146 = vperm.xlu1 %646, %v128_v30   ;;  %v1072_v42 = vld [vmem:[%s1123_s1 + $0x18] sm:$0xff]  ;;  %v420_v44 = vld [vmem:[#allocation8] sm:$0xff]  ;;  %v422_v45 = vld [vmem:[#allocation8 + $0x10] sm:$0xff]  ;;  %v430_v48 = vmul.f32 %v418_v39, %v1062_v38  ;;  %v429_v53 = vmul.f32 %v417_v41, %v1067_v40  ;;  %s929_s1 = smov [#allocation12]  }
  0x6a   :  { %v421_v49 = vld [vmem:[#allocation8 + $0x8] sm:$0xff]  ;;  %v423_v50 = vld [vmem:[#allocation8 + $0x18] sm:$0xff]  ;;  %v431_v54 = vmul.f32 %v419_v43, %v1072_v42  ;;  %v460_v59 = vmul.f32 %v420_v44, %v1057_v36  ;;  %v462_v60 = vmul.f32 %v422_v45, %v1062_v38  ;;  %s572_s22 = sshll.u32 %s929_s1, 4  ;;  %s573_s22 = int_to_ptr.vmem [resolvable:$true] %s572_s22 }
  0x6b   :  { %313 = vmatpush1.bf16.msra.mxu0 %v669_v15  ;;  %366 = vmatpush1.bf16.msra.mxu1 %v670_v16  ;;  %v461_v1 = vmul.f32 %v421_v49, %v1067_v40  ;;  %v463_v2 = vmul.f32 %v423_v50, %v1072_v42  ;;  %s865_s10 = scalar_lea.vmem %s573_s22, 512  ;;  %p870_p13 = scmp.lt.s32.totalorder %s573_s22, %s573_s22 }
  0x6c   :  { %314 = vmatprep.subr.bf16.mxu0 %v671_v17  ;;  %367 = vmatprep.subr.bf16.mxu1 %v673_v18  ;;  %p866_p12 = scmp.ne.s32.totalorder %s573_s22, %s865_s10  ;;  %p871_p0 = scmp.lt.s32.totalorder %s865_s10, %s865_s10 }
  0x6e   :  { %p872_p1 = por %p871_p0, %p870_p13 }
  0x6f   :  { %315 = vmatpush1.bf16.msra.mxu0 %v675_v19  ;;  %368 = vmatpush1.bf16.msra.mxu1 %v676_v20 }
  0x70   :  { %316 = vmatprep.subr.bf16.mxu0 %v677_v21  ;;  %369 = vmatprep.subr.bf16.mxu1 %v679_v22  ;;  %p873_p2 = pnand %p872_p1, %p866_p12 }
  0x73   :  { %317 = vmatpush1.bf16.msra.mxu0 %v681_v23  ;;  %370 = vmatpush1.bf16.msra.mxu1 %v682_v24 }
  0x74   :  { %318 = vmatprep.subr.bf16.mxu0 %v683_v26  ;;  %371 = vmatprep.subr.bf16.mxu1 %v685_v27 }
  0x77   :  { %319 = vmatpush1.bf16.msra.mxu0 %v687_v31  ;;  %372 = vmatpush1.bf16.msra.mxu1 %v688_v32 }
  0x7a   :  { %617 = vmatmul.mubr.msk.bf16.vlgmr.msra.gmra.mrb[0].mxu0 %vm299_vm0, %v689_v33  ;;  %619 = vmatmul.mubr.msk.bf16.vlgmr.msra.gmra.mrb[0].mxu1 %vm299_vm0, %v689_v33 }
  0x7b   :  { %348 = vmatprep.mubr.bf16.mxu0 %v928_v0  ;;  %401 = vmatprep.mubr.bf16.mxu1 %v928_v0 }
  0x82   :  { %618 = vmatmul.mubr.msk.bf16.gmra.mrb[4].mxu0 %vm299_vm0, %v690_v34  ;;  %620 = vmatmul.mubr.msk.bf16.gmra.mrb[4].mxu1 %vm299_vm0, %v690_v34 }
  0xe4   :  { %v132_v35 = vpop.permute.xlu0 %131  ;;  %v142_v22 = vpop.permute.xlu1 %141 }
  0xe8   :  { %v137_v46 = vpop.permute.xlu0 %136 }
 0x14d   :  { %v340_v51 = vpop.f32.mrb[0].mxu0  ;;  %v393_v52 = vpop.f32.mrb[0].mxu1 }
 0x14e   :  { %v341_v55 = vadd.f32 %v340_v51, %v132_v35  ;;  %v394_v56 = vadd.f32 %v393_v52, %v132_v35  ;;  %v342_v57 = vpop.f32.mrb[1].mxu0  ;;  %v395_v58 = vpop.f32.mrb[1].mxu1 }
 0x14f   :  { %v343_v61 = vadd.f32 %v342_v57, %v132_v35  ;;  %v396_v62 = vadd.f32 %v395_v58, %v132_v35  ;;  %v344_v63 = vpop.f32.mrb[2].mxu0  ;;  %v397_v0 = vpop.f32.mrb[2].mxu1 }
 0x150   :  { %v432_v3 = vadd.f32 %v428_v47, %v341_v55  ;;  %v434_v4 = vadd.f32 %v430_v48, %v394_v56  ;;  %v345_v5 = vadd.f32 %v344_v63, %v137_v46  ;;  %v398_v6 = vadd.f32 %v397_v0, %v137_v46  ;;  %v346_v7 = vpop.f32.mrb[3].mxu0  ;;  %v399_v8 = vpop.f32.mrb[3].mxu1 }
 0x151   :  { %v433_v9 = vadd.f32 %v429_v53, %v343_v61  ;;  %v435_v10 = vadd.f32 %v431_v54, %v396_v62  ;;  %v347_v11 = vadd.f32 %v346_v7, %v137_v46  ;;  %v400_v12 = vadd.f32 %v399_v8, %v137_v46 }
 0x152   :  { %v621_v13 = vmul.f32 -1.442695, %v432_v3  ;;  %v623_v14 = vmul.f32 -1.442695, %v434_v4  ;;  %v464_v15 = vadd.f32 %v460_v59, %v345_v5  ;;  %v466_v16 = vadd.f32 %v462_v60, %v398_v6 }
 0x153   :  { %v622_v17 = vmul.f32 -1.442695, %v433_v9  ;;  %v624_v18 = vmul.f32 -1.442695, %v435_v10  ;;  %v465_v19 = vadd.f32 %v461_v1, %v347_v11  ;;  %v467_v20 = vadd.f32 %v463_v2, %v400_v12  ;;  %v424_v10 = vld [vmem:[#allocation10] sm:$0xff]  ;;  %v147_v11 = vpop.permute.xlu1 %146 }
 0x154   :  { %691 = vpow2.f32 %v621_v13  ;;  %v625_v21 = vmul.f32 -1.442695, %v464_v15  ;;  %v627_v23 = vmul.f32 -1.442695, %v466_v16 }
 0x155   :  { %693 = vpow2.f32 %v623_v14  ;;  %v350_v24 = vpop.f32.mrb[4].mxu0  ;;  %v403_v25 = vpop.f32.mrb[4].mxu1  ;;  %v626_v26 = vmul.f32 -1.442695, %v465_v19  ;;  %v628_v29 = vmul.f32 -1.442695, %v467_v20 }
 0x156   :  { %695 = vpow2.f32 %v622_v17  ;;  %v352_v27 = vpop.f32.mrb[5].mxu0  ;;  %v405_v28 = vpop.f32.mrb[5].mxu1  ;;  %v351_v34 = vadd.f32 %v350_v24, %v142_v22  ;;  %v404_v35 = vadd.f32 %v403_v25, %v142_v22  ;;  %v426_v14 = vld [vmem:[#allocation10 + $0x10] sm:$0xff] }
 0x157   :  { %697 = vpow2.f32 %v624_v18  ;;  %v1082_v30 = vpop.f32.mrb[6].mxu0  ;;  %v1084_v31 = vpop.f32.mrb[6].mxu1  ;;  %v353_v37 = vadd.f32 %v352_v27, %v142_v22  ;;  %v406_v39 = vadd.f32 %v405_v28, %v142_v22  ;;  %v425_v18 = vld [vmem:[#allocation10 + $0x8] sm:$0xff]  ;;  %v427_v22 = vld [vmem:[#allocation10 + $0x18] sm:$0xff] }
 0x158   :  { %699 = vpow2.f32 %v625_v21  ;;  %v1086_v32 = vpop.f32.mrb[7].mxu0  ;;  %v1088_v33 = vpop.f32.mrb[7].mxu1  ;;  %v355_v20 = vadd.f32 %v1082_v30, %v147_v11 }
 0x159   :  { %701 = vpow2.f32 %v627_v23  ;;  %v408_v23 = vadd.f32 %v1084_v31, %v147_v11 }
 0x15a   :  { %703 = vpow2.f32 %v626_v26 }
 0x15b   :  { %705 = vpow2.f32 %v628_v29 }
 0x15c   :  { %707 = vtanh.f32 %v351_v34 }
 0x15d   :  { %709 = vtanh.f32 %v404_v35 }
 0x15e   :  { %v692_v41 = vpop.eup %691  ;;  %711 = vtanh.f32 %v353_v37 }
 0x15f   :  { %v694_v43 = vpop.eup %693  ;;  %v448_v44 = vadd.f32 1.0, %v692_v41  ;;  %713 = vtanh.f32 %v406_v39 }
 0x160   :  { %v696_v45 = vpop.eup %695  ;;  %v450_v46 = vadd.f32 1.0, %v694_v43 }
 0x161   :  { %v698_v47 = vpop.eup %697  ;;  %715 = vrcp.f32 %v448_v44  ;;  %v449_v48 = vadd.f32 1.0, %v696_v45 }
 0x162   :  { %v700_v49 = vpop.eup %699  ;;  %717 = vrcp.f32 %v450_v46  ;;  %v451_v50 = vadd.f32 1.0, %v698_v47 }
 0x163   :  { %v702_v51 = vpop.eup %701  ;;  %719 = vrcp.f32 %v449_v48  ;;  %v480_v52 = vadd.f32 1.0, %v700_v49 }
 0x164   :  { %v704_v53 = vpop.eup %703  ;;  %721 = vrcp.f32 %v451_v50  ;;  %v482_v54 = vadd.f32 1.0, %v702_v51 }
 0x165   :  { %v706_v55 = vpop.eup %705  ;;  %723 = vrcp.f32 %v480_v52  ;;  %v481_v56 = vadd.f32 1.0, %v704_v53 }
 0x166   :  { %725 = vrcp.f32 %v482_v54  ;;  %v483_v57 = vadd.f32 1.0, %v706_v55  ;;  %v708_v58 = vpop.eup %707 }
 0x167   :  { %727 = vrcp.f32 %v481_v56  ;;  %v710_v59 = vpop.eup %709 }
 0x168   :  { %729 = vrcp.f32 %v483_v57  ;;  %v712_v60 = vpop.eup %711 }
 0x169   :  { %v714_v61 = vpop.eup %713 }
 0x16b   :  { %v716_v62 = vpop.eup %715 }
 0x16c   :  { %v718_v63 = vpop.eup %717  ;;  %v500_v0 = vmul.f32 %v716_v62, %v708_v58 }
 0x16d   :  { %v720_v1 = vpop.eup %719  ;;  %v502_v2 = vmul.f32 %v718_v63, %v710_v59 }
 0x16e   :  { %v722_v3 = vpop.eup %721  ;;  %v501_v4 = vmul.f32 %v720_v1, %v712_v60 }
 0x16f   :  { %v724_v5 = vpop.eup %723  ;;  %v503_v6 = vmul.f32 %v722_v3, %v714_v61 }
 0x170   :  { %v726_v7 = vpop.eup %725  ;;  %v492_v8 = vmul.f32 %v724_v5, %v1057_v36 }
 0x171   :  { %v728_v9 = vpop.eup %727  ;;  %v494_v12 = vmul.f32 %v726_v7, %v1062_v38 }
 0x172   :  { %v730_v13 = vpop.eup %729  ;;  %v504_v15 = vadd.f32 %v500_v0, %v492_v8  ;;  %v493_v16 = vmul.f32 %v728_v9, %v1067_v40  ;;  %v357_v40 = vadd.f32 %v1086_v32, %v147_v11 }
 0x173   :  { %v506_v17 = vadd.f32 %v502_v2, %v494_v12  ;;  %v495_v19 = vmul.f32 %v730_v13, %v1072_v42  ;;  %v410_v42 = vadd.f32 %v1088_v33, %v147_v11 }
 0x174   :  { %v508_v21 = vmul.f32 %v504_v15, %v424_v10  ;;  %552 = vst [vmem:[#allocation12] sm:$0xff] %v504_v15  ;;  %v505_v36 = vadd.f32 %v501_v4, %v493_v16 }
 0x175   :  { %v510_v38 = vmul.f32 %v506_v17, %v426_v14  ;;  %554 = vst [vmem:[#allocation12 + $0x10] sm:$0xff] %v506_v17  ;;  %v507_v24 = vadd.f32 %v503_v6, %v495_v19 }
 0x176   :  { %v512_v25 = vadd.f32 %v508_v21, %v355_v20  ;;  %v509_v26 = vmul.f32 %v505_v36, %v425_v18  ;;  %553 = vst [vmem:[#allocation12 + $0x8] sm:$0xff] %v505_v36 }
 0x177   :  { %v514_v27 = vadd.f32 %v510_v38, %v408_v23  ;;  %v511_v28 = vmul.f32 %v507_v24, %v427_v22  ;;  %555 = vst [vmem:[#allocation12 + $0x18] sm:$0xff] %v507_v24 }
 0x178   :  { %v629_v29 = vmul.f32 -1.442695, %v512_v25  ;;  %v513_v30 = vadd.f32 %v509_v26, %v357_v40 }
 0x179   :  { %876 = shalt.err (!%p873_p2)
}
 0x17a   :  { %s877_s13 = scalar_lea.hbm %s1130_s8, 512 }
 0x17b   :  { %p878_p3 = scmp.ne.s32.totalorder %s1130_s8, %s877_s13  ;;  %p881_p4 = scmp.lt.u32.totalorder %s877_s13, %s1130_s8 }
 0x17d   :  { %p883_p5 = pnand %p881_p4, %p878_p3 }
 0x17f   :  { %886 = shalt.err (!%p883_p5)
}
 0x180   :  { %575 = dma.vmem_to_hbm [thread:$0]  %s573_s22, 512, %s1130_s8, [#allocation13]   ;;  %v631_v31 = vmul.f32 -1.442695, %v514_v27  ;;  %v515_v32 = vadd.f32 %v511_v28, %v410_v42  ;;  %731 = vpow2.f32 %v629_v29  ;;  %v630_v33 = vmul.f32 -1.442695, %v513_v30 }
 0x181   :  { %s930_s8 = smov [#allocation11]  }
 0x182   :  { %733 = vpow2.f32 %v631_v31  ;;  %v632_v34 = vmul.f32 -1.442695, %v515_v32  ;;  %s562_s18 = sshll.u32 %s930_s8, 4  ;;  %s563_s18 = int_to_ptr.vmem [resolvable:$true] %s562_s18 }
 0x183   :  { %735 = vpow2.f32 %v630_v33  ;;  %s887_s6 = scalar_lea.vmem %s563_s18, 512  ;;  %p892_p7 = scmp.lt.s32.totalorder %s563_s18, %s563_s18 }
 0x184   :  { %737 = vpow2.f32 %v632_v34  ;;  %p888_p6 = scmp.ne.s32.totalorder %s563_s18, %s887_s6  ;;  %p893_p8 = scmp.lt.s32.totalorder %s887_s6, %s887_s6 }
 0x185   :  { %739 = vtanh.f32 %v504_v15 }
 0x186   :  { %741 = vtanh.f32 %v506_v17  ;;  %p894_p9 = por %p893_p8, %p892_p7 }
 0x187   :  { %743 = vtanh.f32 %v505_v36 }
 0x188   :  { %745 = vtanh.f32 %v507_v24  ;;  %p895_p10 = pnand %p894_p9, %p888_p6 }
 0x18a   :  { %v732_v35 = vpop.eup %731 }
 0x18b   :  { %v528_v39 = vadd.f32 1.0, %v732_v35 }
 0x18c   :  { %v734_v37 = vpop.eup %733 }
 0x18d   :  { %v736_v41 = vpop.eup %735  ;;  %v530_v43 = vadd.f32 1.0, %v734_v37  ;;  %747 = vrcp.f32 %v528_v39 }
 0x18e   :  { %v738_v44 = vpop.eup %737  ;;  %v529_v45 = vadd.f32 1.0, %v736_v41 }
 0x18f   :  { %749 = vrcp.f32 %v530_v43  ;;  %v531_v46 = vadd.f32 1.0, %v738_v44  ;;  %v740_v47 = vpop.eup %739 }
 0x190   :  { %751 = vrcp.f32 %v529_v45  ;;  %v742_v48 = vpop.eup %741 }
 0x191   :  { %753 = vrcp.f32 %v531_v46  ;;  %v744_v49 = vpop.eup %743 }
 0x192   :  { %v746_v50 = vpop.eup %745 }
 0x197   :  { %v748_v51 = vpop.eup %747 }
 0x198   :  { %v544_v53 = vmul.f32 %v748_v51, %v740_v47 }
 0x199   :  { %v750_v52 = vpop.eup %749 }
 0x19a   :  { %v752_v54 = vpop.eup %751  ;;  %v546_v55 = vmul.f32 %v750_v52, %v742_v48  ;;  %548 = vst [vmem:[#allocation11] sm:$0xff] %v544_v53 }
 0x19b   :  { %v754_v56 = vpop.eup %753  ;;  %v545_v57 = vmul.f32 %v752_v54, %v744_v49 }
 0x19c   :  { %v547_v58 = vmul.f32 %v754_v56, %v746_v50  ;;  %550 = vst [vmem:[#allocation11 + $0x10] sm:$0xff] %v546_v55 }
 0x19d   :  { %549 = vst [vmem:[#allocation11 + $0x8] sm:$0xff] %v545_v57 }
 0x19e   :  { %551 = vst [vmem:[#allocation11 + $0x18] sm:$0xff] %v547_v58 }
 0x19f   :  { %898 = shalt.err (!%p895_p10)
}
 0x1a0   :  { %s899_s21 = scalar_lea.hbm %s1129_s7, 512 }
 0x1a1   :  { %p900_p11 = scmp.ne.s32.totalorder %s1129_s7, %s899_s21  ;;  %p903_p12 = scmp.lt.u32.totalorder %s899_s21, %s1129_s7 }
 0x1a3   :  { %p905_p13 = pnand %p903_p12, %p900_p11 }
 0x1a5   :  { %908 = shalt.err (!%p905_p13)
}
 0x1a6   :  { %565 = dma.vmem_to_hbm [thread:$0]  %s563_s18, 512, %s1129_s7, [#allocation4]  }
 0x1a7   :  { %915 = dma.done.wait [#allocation4], 512  }
 0x1a8   :  { %916 = vsyncadd [#allocation4], 4294966784 }
 0x1a9   :  { %917 = dma.done.wait [#allocation13], 512  }
 0x1aa   :  { %918 = vsyncadd [#allocation13], 4294966784 }
 0x1ab   :  { %582 = vsyncpa [#allocation3], 1 }
 0x1ac   :  { %583 = vsyncpa [#allocation6], 1 }
 0x1ad   :  { %584 = vsyncpa [#allocation9], 1 }
 0x1ae   :  { %585 = vsyncpa [#allocation4], 1 }
 0x1af   :  { %586 = vsyncpa [#allocation13], 1 }

</bundles_post_ra>
